<compile_context>
chip_gen: v6e
topology: v6e:2x2x1
jax: 0.10.0
libtpu: 0.0.40
codegen_flags: <defaults>
</compile_context>

<pallas_src>
import functools

import jax
import jax.numpy as jnp
from jax.experimental import pallas as pl
from jax.experimental.pallas import tpu as pltpu

_LANE = 128   # lane width of a vreg
_SUB = 8      # sublane count of a vreg


def two_layer_xor_kernel(x_ref, w1_ref, b1_ref, w2_ref, b2_ref, o_ref):
    # x_ref:  [2, 8, tc] VMEM, dense (x_ref[k, s, c] = feature k of batch b = s*C + c)
    # w1_ref: [2, 4] SMEM    b1_ref: [4] SMEM
    # w2_ref: [4]    SMEM    b2_ref: [1] SMEM
    # o_ref:  [8, tc] VMEM, dense
    x0 = x_ref[0]                                   # [8, tc]
    x1 = x_ref[1]                                   # [8, tc]

    # Layer-2 bias as the accumulator init (scalar splat, hoisted once).
    acc = jnp.zeros_like(x0) + b2_ref[0]

    # Hidden width is a static 4 -> fully unrolled VPU broadcast-FMAs, no MXU.
    for j in range(4):
        h = x0 * w1_ref[0, j] + x1 * w1_ref[1, j] + b1_ref[j]   # Linear(2,4)[:, j]
        acc = acc + jnp.maximum(h, 0.0) * w2_ref[j]             # ReLU + Linear(4,1)

    o_ref[...] = acc


@functools.partial(jax.jit, static_argnames=("block_b",))
def two_layer_xor_net(x, w1, b1, w2, b2, *, block_b=512 * 1024):
    """Forward pass of TwoLayerXORNet.

    x:  [B, 2] float32
    w1: [2, 4] float32  (== torch layer1.weight.T)
    b1: [4]    float32
    w2: [4, 1] float32  (== torch layer2.weight.T)
    b2: [1]    float32
    returns [B, 1] float32
    """
    B = x.shape[0]
    assert x.shape[1] == 2
    x = x.astype(jnp.float32)

    # Dense (sublane=8, lane=C) packing of the batch: b = s*C + c.
    C = pl.cdiv(B, _SUB)
    b8 = C * _SUB
    xp = jnp.pad(x, ((0, b8 - B), (0, 0)))          # tiny (<8 rows) tail pad only
    xpk = xp.T.reshape(2, _SUB, C)                  # single fused relayout under jit

    # Lane-tile size: big blocks amortize the ~0.35us/step overhead.  VMEM cost
    # per step (x + out, double-buffered) = 192 * tc bytes -> ~12.6 MiB at the
    # default block_b, safely inside every generation's VMEM (incl. v7x 64 MiB).
    tc_max = max(_LANE, ((block_b // _SUB) // _LANE) * _LANE)
    if C <= tc_max:
        tc = C                                       # one block == full lane extent
    else:
        tc = tc_max                                  # ragged last block is masked
    grid = (pl.cdiv(C, tc),)

    smem = pl.BlockSpec(memory_space=pltpu.MemorySpace.SMEM)

    out = pl.pallas_call(
        two_layer_xor_kernel,
        out_shape=jax.ShapeDtypeStruct((_SUB, C), jnp.float32),
        grid=grid,
        in_specs=[
            pl.BlockSpec((2, _SUB, tc), lambda i: (0, 0, i)),   # x slab (VMEM, dense)
            smem,                                               # w1 [2, 4]
            smem,                                               # b1 [4]
            smem,                                               # w2 [4]
            smem,                                               # b2 [1]
        ],
        out_specs=pl.BlockSpec((_SUB, tc), lambda i: (0, i)),
        compiler_params=pltpu.CompilerParams(
            # Independent batch tiles -> shard the grid across TCs on v7x.
            dimension_semantics=("parallel",),
            vmem_limit_bytes=32 * 1024 * 1024,
        ),
    )(
        xpk,
        w1.astype(jnp.float32),
        b1.astype(jnp.float32),
        w2.reshape(4).astype(jnp.float32),
        b2.astype(jnp.float32),
    )

    # [8, C] row-major is exactly flat batch order b = s*C + c: free reshape,
    # cheap slice, no transpose pass.
    return out.reshape(b8)[:B, None]


if __name__ == "__main__":
    key = jax.random.PRNGKey(0)
    k_x, k_w1, k_b1, k_w2, k_b2 = jax.random.split(key, 5)

    # Deterministic parameter init (synthetic; mimics nn.Linear fan-in uniform),
    # stored in x @ W + b orientation (i.e. torch weight transposed).
    bound1 = 1.0 / jnp.sqrt(2.0)
    w1 = jax.random.uniform(k_w1, (2, 4), jnp.float32, -bound1, bound1)
    b1 = jax.random.uniform(k_b1, (4,), jnp.float32, -bound1, bound1)
    bound2 = 1.0 / jnp.sqrt(4.0)
    w2 = jax.random.uniform(k_w2, (4, 1), jnp.float32, -bound2, bound2)
    b2 = jax.random.uniform(k_b2, (1,), jnp.float32, -bound2, bound2)

    def ref_fwd(xx):
        return jnp.maximum(xx @ w1 + b1, 0.0) @ w2 + b2

    # Small batch (e.g. the 4 XOR inputs repeated twice): single dense slab.
    x = jax.random.normal(k_x, (8, 2), dtype=jnp.float32)
    out = jax.block_until_ready(two_layer_xor_net(x, w1, b1, w2, b2))
    assert out.shape == (8, 1)
    assert jnp.allclose(out, ref_fwd(x), atol=1e-5, rtol=1e-5)

    # Larger batch with a deliberately small block: multi-step grid + ragged
    # (masked) last block, non-multiple-of-128 lane extent.
    x_big = jax.random.normal(k_x, (2400, 2), dtype=jnp.float32)
    out_big = jax.block_until_ready(
        two_layer_xor_net(x_big, w1, b1, w2, b2, block_b=2048))
    assert out_big.shape == (2400, 1)
    assert jnp.allclose(out_big, ref_fwd(x_big), atol=1e-5, rtol=1e-5)

    print("KERNEL_OK")
</pallas_src>

<mosaic_0001>
module attributes {stable_mosaic.version = 11 : i64} {
  func.func @two_layer_xor_kernel(%arg0: i32, %arg1: memref<2x8x1xf32, #tpu.memory_space<vmem>>, %arg2: memref<2x4xf32, #tpu.memory_space<smem>>, %arg3: memref<4xf32, #tpu.memory_space<smem>>, %arg4: memref<4xf32, #tpu.memory_space<smem>>, %arg5: memref<1xf32, #tpu.memory_space<smem>>, %arg6: memref<8x1xf32, #tpu.memory_space<vmem>>) attributes {dimension_semantics = [#tpu.dimension_semantics<parallel>], iteration_bounds = array<i64: 1>, scalar_prefetch = 0 : i64, scratch_operands = 0 : i64, tpu.core_type = #tpu.core_type<tc>, window_params = [{transform_indices = @transform_0, window_bounds = array<i64: 2, 8, 1>}, {transform_indices = @transform_1, window_bounds = array<i64: 2, 4>}, {transform_indices = @transform_2, window_bounds = array<i64: 4>}, {transform_indices = @transform_3, window_bounds = array<i64: 4>}, {transform_indices = @transform_4, window_bounds = array<i64: 1>}, {transform_indices = @transform_5, window_bounds = array<i64: 8, 1>}]} {
    %c0 = arith.constant 0 : index
    %c0_0 = arith.constant 0 : index
    %c0_1 = arith.constant 0 : index
    %0 = vector.load %arg1[%c0, %c0_0, %c0_1] : memref<2x8x1xf32, #tpu.memory_space<vmem>>, vector<1x8x1xf32>
    %1 = vector.shape_cast %0 : vector<1x8x1xf32> to vector<8x1xf32>
    %c1 = arith.constant 1 : index
    %c0_2 = arith.constant 0 : index
    %c0_3 = arith.constant 0 : index
    %2 = vector.load %arg1[%c1, %c0_2, %c0_3] : memref<2x8x1xf32, #tpu.memory_space<vmem>>, vector<1x8x1xf32>
    %3 = vector.shape_cast %2 : vector<1x8x1xf32> to vector<8x1xf32>
    %cst = arith.constant 0.000000e+00 : f32
    %4 = vector.broadcast %cst : f32 to vector<8x1xf32>
    %c0_4 = arith.constant 0 : index
    %5 = memref.load %arg5[%c0_4] : memref<1xf32, #tpu.memory_space<smem>>
    %6 = vector.broadcast %5 : f32 to vector<8x1xf32>
    %7 = arith.addf %4, %6 : vector<8x1xf32>
    %c0_5 = arith.constant 0 : index
    %c0_6 = arith.constant 0 : index
    %8 = memref.load %arg2[%c0_5, %c0_6] : memref<2x4xf32, #tpu.memory_space<smem>>
    %9 = vector.broadcast %8 : f32 to vector<8x1xf32>
    %10 = arith.mulf %1, %9 : vector<8x1xf32>
    %c1_7 = arith.constant 1 : index
    %c0_8 = arith.constant 0 : index
    %11 = memref.load %arg2[%c1_7, %c0_8] : memref<2x4xf32, #tpu.memory_space<smem>>
    %12 = vector.broadcast %11 : f32 to vector<8x1xf32>
    %13 = arith.mulf %3, %12 : vector<8x1xf32>
    %14 = arith.addf %10, %13 : vector<8x1xf32>
    %c0_9 = arith.constant 0 : index
    %15 = memref.load %arg3[%c0_9] : memref<4xf32, #tpu.memory_space<smem>>
    %16 = vector.broadcast %15 : f32 to vector<8x1xf32>
    %17 = arith.addf %14, %16 : vector<8x1xf32>
    %cst_10 = arith.constant 0.000000e+00 : f32
    %18 = vector.broadcast %cst_10 : f32 to vector<8x1xf32>
    %19 = arith.maximumf %17, %18 : vector<8x1xf32>
    %c0_11 = arith.constant 0 : index
    %20 = memref.load %arg4[%c0_11] : memref<4xf32, #tpu.memory_space<smem>>
    %21 = vector.broadcast %20 : f32 to vector<8x1xf32>
    %22 = arith.mulf %19, %21 : vector<8x1xf32>
    %23 = arith.addf %7, %22 : vector<8x1xf32>
    %c0_12 = arith.constant 0 : index
    %c1_13 = arith.constant 1 : index
    %24 = memref.load %arg2[%c0_12, %c1_13] : memref<2x4xf32, #tpu.memory_space<smem>>
    %25 = vector.broadcast %24 : f32 to vector<8x1xf32>
    %26 = arith.mulf %1, %25 : vector<8x1xf32>
    %c1_14 = arith.constant 1 : index
    %c1_15 = arith.constant 1 : index
    %27 = memref.load %arg2[%c1_14, %c1_15] : memref<2x4xf32, #tpu.memory_space<smem>>
    %28 = vector.broadcast %27 : f32 to vector<8x1xf32>
    %29 = arith.mulf %3, %28 : vector<8x1xf32>
    %30 = arith.addf %26, %29 : vector<8x1xf32>
    %c1_16 = arith.constant 1 : index
    %31 = memref.load %arg3[%c1_16] : memref<4xf32, #tpu.memory_space<smem>>
    %32 = vector.broadcast %31 : f32 to vector<8x1xf32>
    %33 = arith.addf %30, %32 : vector<8x1xf32>
    %cst_17 = arith.constant 0.000000e+00 : f32
    %34 = vector.broadcast %cst_17 : f32 to vector<8x1xf32>
    %35 = arith.maximumf %33, %34 : vector<8x1xf32>
    %c1_18 = arith.constant 1 : index
    %36 = memref.load %arg4[%c1_18] : memref<4xf32, #tpu.memory_space<smem>>
    %37 = vector.broadcast %36 : f32 to vector<8x1xf32>
    %38 = arith.mulf %35, %37 : vector<8x1xf32>
    %39 = arith.addf %23, %38 : vector<8x1xf32>
    %c0_19 = arith.constant 0 : index
    %c2 = arith.constant 2 : index
    %40 = memref.load %arg2[%c0_19, %c2] : memref<2x4xf32, #tpu.memory_space<smem>>
    %41 = vector.broadcast %40 : f32 to vector<8x1xf32>
    %42 = arith.mulf %1, %41 : vector<8x1xf32>
    %c1_20 = arith.constant 1 : index
    %c2_21 = arith.constant 2 : index
    %43 = memref.load %arg2[%c1_20, %c2_21] : memref<2x4xf32, #tpu.memory_space<smem>>
    %44 = vector.broadcast %43 : f32 to vector<8x1xf32>
    %45 = arith.mulf %3, %44 : vector<8x1xf32>
    %46 = arith.addf %42, %45 : vector<8x1xf32>
    %c2_22 = arith.constant 2 : index
    %47 = memref.load %arg3[%c2_22] : memref<4xf32, #tpu.memory_space<smem>>
    %48 = vector.broadcast %47 : f32 to vector<8x1xf32>
    %49 = arith.addf %46, %48 : vector<8x1xf32>
    %cst_23 = arith.constant 0.000000e+00 : f32
    %50 = vector.broadcast %cst_23 : f32 to vector<8x1xf32>
    %51 = arith.maximumf %49, %50 : vector<8x1xf32>
    %c2_24 = arith.constant 2 : index
    %52 = memref.load %arg4[%c2_24] : memref<4xf32, #tpu.memory_space<smem>>
    %53 = vector.broadcast %52 : f32 to vector<8x1xf32>
    %54 = arith.mulf %51, %53 : vector<8x1xf32>
    %55 = arith.addf %39, %54 : vector<8x1xf32>
    %c0_25 = arith.constant 0 : index
    %c3 = arith.constant 3 : index
    %56 = memref.load %arg2[%c0_25, %c3] : memref<2x4xf32, #tpu.memory_space<smem>>
    %57 = vector.broadcast %56 : f32 to vector<8x1xf32>
    %58 = arith.mulf %1, %57 : vector<8x1xf32>
    %c1_26 = arith.constant 1 : index
    %c3_27 = arith.constant 3 : index
    %59 = memref.load %arg2[%c1_26, %c3_27] : memref<2x4xf32, #tpu.memory_space<smem>>
    %60 = vector.broadcast %59 : f32 to vector<8x1xf32>
    %61 = arith.mulf %3, %60 : vector<8x1xf32>
    %62 = arith.addf %58, %61 : vector<8x1xf32>
    %c3_28 = arith.constant 3 : index
    %63 = memref.load %arg3[%c3_28] : memref<4xf32, #tpu.memory_space<smem>>
    %64 = vector.broadcast %63 : f32 to vector<8x1xf32>
    %65 = arith.addf %62, %64 : vector<8x1xf32>
    %cst_29 = arith.constant 0.000000e+00 : f32
    %66 = vector.broadcast %cst_29 : f32 to vector<8x1xf32>
    %67 = arith.maximumf %65, %66 : vector<8x1xf32>
    %c3_30 = arith.constant 3 : index
    %68 = memref.load %arg4[%c3_30] : memref<4xf32, #tpu.memory_space<smem>>
    %69 = vector.broadcast %68 : f32 to vector<8x1xf32>
    %70 = arith.mulf %67, %69 : vector<8x1xf32>
    %71 = arith.addf %55, %70 : vector<8x1xf32>
    %c0_31 = arith.constant 0 : index
    %c0_32 = arith.constant 0 : index
    %72 = vector.load %arg6[%c0_31, %c0_32] : memref<8x1xf32, #tpu.memory_space<vmem>>, vector<8x1xf32>
    tpu.vector_store %arg6[%c0_31, %c0_32], %71 {strides = array<i32>} : memref<8x1xf32, #tpu.memory_space<vmem>>, vector<8x1xf32>,
    return
  }
  func.func @transform_0(%arg0: i32) -> (i32, i32, i32) {
    %c0_i32 = arith.constant 0 : i32
    %c0_i32_0 = arith.constant 0 : i32
    %c0_i32_1 = arith.constant 0 : i32
    return %c0_i32, %c0_i32_0, %arg0 : i32, i32, i32
  }
  func.func @transform_1(%arg0: i32) -> (i32, i32) {
    %c0_i32 = arith.constant 0 : i32
    %c0_i32_0 = arith.constant 0 : i32
    %c0_i32_1 = arith.constant 0 : i32
    return %c0_i32, %c0_i32_0 : i32, i32
  }
  func.func @transform_2(%arg0: i32) -> i32 {
    %c0_i32 = arith.constant 0 : i32
    %c0_i32_0 = arith.constant 0 : i32
    return %c0_i32 : i32
  }
  func.func @transform_3(%arg0: i32) -> i32 {
    %c0_i32 = arith.constant 0 : i32
    %c0_i32_0 = arith.constant 0 : i32
    return %c0_i32 : i32
  }
  func.func @transform_4(%arg0: i32) -> i32 {
    %c0_i32 = arith.constant 0 : i32
    %c0_i32_0 = arith.constant 0 : i32
    return %c0_i32 : i32
  }
  func.func @transform_5(%arg0: i32) -> (i32, i32) {
    %c0_i32 = arith.constant 0 : i32
    %c0_i32_0 = arith.constant 0 : i32
    return %c0_i32, %arg0 : i32, i32
  }
}

</mosaic_0001>

<bundles_post_ra>
// kernel: two_layer_xor_net.1
= control target key start
LH: loop header
LB: loop body
LE: loop exit
PB: predicated region body
PF: predicated region fallthrough
CT: control target
= control target key end

     0   :  { %11 = vsyncpa [#allocation4], 0  ;;  %s251_s0 = inlined_call_operand.vmem [shape: f32[2,8,1], index: 0, kind: input, shape index: {}]   ;;  %s252_s1 = inlined_call_operand.vmem [shape: f32[2,4], index: 1, kind: input, shape index: {}]   ;;  %s253_s2 = inlined_call_operand.vmem [shape: f32[4], index: 2, kind: input, shape index: {}]   ;;  %s254_s3 = inlined_call_operand.vmem [shape: f32[4], index: 3, kind: input, shape index: {}]   ;;  %s255_s4 = inlined_call_operand.<no memory space> [shape: f32[1], index: 4, kind: input, shape index: {}]   ;;  %s256_s5 = inlined_call_operand.vmem [shape: f32[8,1], index: 5, kind: output, shape index: {}]  }
   0x1   :  { %12 = vsyncpa [#allocation6], 0  ;;  %s31_s20 = sshll.u32 %s253_s2, 4  ;;  %s21_s23 = sshll.u32 %s252_s1, 4  ;;  %s32_s20 = int_to_ptr.vmem [resolvable:$true] %s31_s20  ;;  %s22_s23 = int_to_ptr.vmem [resolvable:$true] %s21_s23 }
   0x2   :  { %s148_s24 = scalar_lea.vmem %s32_s20, 16  ;;  %p153_p1 = scmp.lt.s32.totalorder %s32_s20, %s32_s20 }
   0x3   :  { %p149_p0 = scmp.ne.s32.totalorder %s32_s20, %s148_s24  ;;  %p154_p2 = scmp.lt.s32.totalorder %s148_s24, %s148_s24 }
   0x5   :  { %p155_p3 = por %p154_p2, %p153_p1 }
   0x7   :  { %p156_p4 = pnand %p155_p3, %p149_p0 }
   0x9   :  { %159 = shalt.err (!%p156_p4)
}
   0xa   :  { %s188_s25 = smov [#allocation5]   ;;  %s160_s26 = scalar_lea.vmem %s22_s23, 32 }
   0xb   :  { %34 = dma.vmem_to_smem %s32_s20, 16, %s188_s25, [#allocation6]  }
   0xc   :  { %p161_p5 = scmp.ne.s32.totalorder %s22_s23, %s160_s26  ;;  %p165_p6 = scmp.lt.s32.totalorder %s22_s23, %s22_s23 }
   0xd   :  { %p166_p7 = scmp.lt.s32.totalorder %s160_s26, %s160_s26 }
   0xf   :  { %p167_p8 = por %p166_p7, %p165_p6 }
  0x11   :  { %p168_p9 = pnand %p167_p8, %p161_p5 }
  0x13   :  { %171 = shalt.err (!%p168_p9)
}
  0x14   :  { %s189_s2 = smov [#allocation3]   ;;  %s41_s28 = sshll.u32 %s254_s3, 4  ;;  %s42_s28 = int_to_ptr.vmem [resolvable:$true] %s41_s28 }
  0x15   :  { %24 = dma.vmem_to_smem %s22_s23, 32, %s189_s2, [#allocation4]  }
  0x16   :  { %s172_s29 = scalar_lea.vmem %s42_s28, 16  ;;  %p177_p11 = scmp.lt.s32.totalorder %s42_s28, %s42_s28 }
  0x17   :  { %p173_p10 = scmp.ne.s32.totalorder %s42_s28, %s172_s29  ;;  %p178_p12 = scmp.lt.s32.totalorder %s172_s29, %s172_s29 }
  0x19   :  { %p179_p13 = por %p178_p12, %p177_p11 }
  0x1b   :  { %p180_p0 = pnand %p179_p13, %p173_p10 }
  0x1d   :  { %183 = shalt.err (!%p180_p0)
}
  0x1e   :  { %s190_s30 = smov [#allocation7]  }
  0x1f   :  { %44 = dma.vmem_to_smem %s42_s28, 16, %s190_s30, [#allocation6]  }
  0x20   :  { %184 = dma.done.wait [#allocation4], 32  }
  0x21   :  { %185 = vsyncadd [#allocation4], 4294967264 }
  0x22   :  { %186 = dma.done.wait [#allocation6], 32  }
  0x23   :  { %187 = vsyncadd [#allocation6], 4294967264 }
  0x24   :  { %56 = sfence }
  0x25   :  { %s63_s6 = sld [smem:[#allocation3]]  ;;  %v57_v0 = vld [vmem:[%s251_s0] sm:$0xff]  ;;  %v131_v1 = vld [vmem:[%s251_s0 + $0x8] sm:$0xff]  ;;  %v61_v18 = vstv %s255_s4  ;;  %vm123_vm0 = vcmask 7168  }
  0x26   :  { %s132_s7 = sld [smem:[#allocation3 + $0x80]] }
  0x27   :  { %s70_s8 = sld [smem:[#allocation5]] }
  0x28   :  { %s230_s9 = sld [smem:[#allocation7]] }
  0x29   :  { %s133_s11 = sld [smem:[#allocation3 + $0x1]] }
  0x2a   :  { %s134_s14 = sld [smem:[#allocation3 + $0x81]] }
  0x2b   :  { %v64_v2 = vstv %s63_s6  ;;  %s135_s15 = sld [smem:[#allocation5 + $0x1]] }
  0x2c   :  { %v65_v3 = vmul.f32 %v64_v2, %v57_v0  ;;  %v67_v4 = vstv %s132_s7  ;;  %s238_s16 = sld [smem:[#allocation7 + $0x1]] }
  0x2d   :  { %v68_v5 = vmul.f32 %v131_v1, %v67_v4  ;;  %s137_s17 = sld [smem:[#allocation3 + $0x2]]  ;;  %v71_v6 = vstv %s70_s8 }
  0x2e   :  { %s138_s18 = sld [smem:[#allocation3 + $0x82]]  ;;  %v75_v13 = vstv %s230_s9 }
  0x2f   :  { %v69_v7 = vadd.f32 %v68_v5, %v65_v3  ;;  %v79_v8 = vstv %s133_s11  ;;  %s139_s19 = sld [smem:[#allocation5 + $0x2]] }
  0x30   :  { %v80_v9 = vmul.f32 %v79_v8, %v57_v0  ;;  %v82_v10 = vstv %s134_s14  ;;  %s240_s20 = sld [smem:[#allocation7 + $0x2]] }
  0x31   :  { %v72_v11 = vadd.f32 %v71_v6, %v69_v7  ;;  %v83_v12 = vmul.f32 %v131_v1, %v82_v10  ;;  %s141_s0 = sld [smem:[#allocation3 + $0x3]]  ;;  %v86_v14 = vstv %s135_s15 }
  0x32   :  { %s142_s21 = sld [smem:[#allocation3 + $0x83]]  ;;  %v90_v24 = vstv %s238_s16 }
  0x33   :  { %v73_v15 = vmax.f32 %v72_v11, 0.0  ;;  %v84_v16 = vadd.f32 %v83_v12, %v80_v9  ;;  %v94_v17 = vstv %s137_s17  ;;  %s143_s22 = sld [smem:[#allocation5 + $0x3]] }
  0x34   :  { %v95_v19 = vmul.f32 %v94_v17, %v57_v0  ;;  %v97_v20 = vstv %s138_s18  ;;  %s144_s25 = sld [smem:[#allocation7 + $0x3]] }
  0x35   :  { %v76_v21 = vmul.f32 %v75_v13, %v73_v15  ;;  %v87_v22 = vadd.f32 %v86_v14, %v84_v16  ;;  %v98_v23 = vmul.f32 %v131_v1, %v97_v20  ;;  %v101_v25 = vstv %s139_s19 }
  0x36   :  { %v105_v35 = vstv %s240_s20 }
  0x37   :  { %v77_v26 = vadd.f32 %v76_v21, %v61_v18  ;;  %v88_v27 = vmax.f32 %v87_v22, 0.0  ;;  %v99_v28 = vadd.f32 %v98_v23, %v95_v19  ;;  %v109_v29 = vstv %s141_s0 }
  0x38   :  { %v110_v30 = vmul.f32 %v109_v29, %v57_v0  ;;  %v112_v31 = vstv %s142_s21 }
  0x39   :  { %v91_v32 = vmul.f32 %v90_v24, %v88_v27  ;;  %v102_v33 = vadd.f32 %v101_v25, %v99_v28  ;;  %v113_v34 = vmul.f32 %v131_v1, %v112_v31  ;;  %v116_v36 = vstv %s143_s22 }
  0x3a   :  { %v120_v42 = vstv %s144_s25 }
  0x3b   :  { %v92_v37 = vadd.f32 %v91_v32, %v77_v26  ;;  %v103_v38 = vmax.f32 %v102_v33, 0.0  ;;  %v114_v39 = vadd.f32 %v113_v34, %v110_v30 }
  0x3d   :  { %v106_v40 = vmul.f32 %v105_v35, %v103_v38  ;;  %v117_v41 = vadd.f32 %v116_v36, %v114_v39 }
  0x3f   :  { %v107_v43 = vadd.f32 %v106_v40, %v92_v37  ;;  %v118_v44 = vmax.f32 %v117_v41, 0.0 }
  0x41   :  { %v121_v45 = vmul.f32 %v120_v42, %v118_v44 }
  0x43   :  { %v122_v46 = vadd.f32 %v121_v45, %v107_v43 }
  0x45   :  { %124 = vst.msk [vmem:[%s256_s5] sm:$0xff] %vm123_vm0, %v122_v46 }
  0x46   :  { %129 = vsyncpa [#allocation4], 1 }
  0x47   :  { %130 = vsyncpa [#allocation6], 1 }

</bundles_post_ra>
